<compile_context>
chip_gen: v7x
topology: tpu7x:2x2x1
jax: 0.10.0
libtpu: 0.0.40
codegen_flags: <defaults>
</compile_context>

<pallas_src>
import jax
import jax.numpy as jnp
import numpy as np
from jax.experimental import pallas as pl
from jax.experimental.pallas import tpu as pltpu

BN_EPS = 1e-5
_VMEM_LIMIT = 32 * 1024 * 1024  # above v5e's 16 MiB default, safe on v6e/v7x


def _round_up(a, m):
    return ((a + m - 1) // m) * m


def _pick_tile_h(h, w, cap_rows=2048):
    """Largest divisor of H with tile_h*W <= cap_rows and tile_h*W % 8 == 0."""
    for t in range(h, 0, -1):
        if h % t == 0 and t * w <= cap_rows and (t * w) % 8 == 0:
            return t
    return h


def _pick_tile_m(m, cap=1024):
    """Largest divisor of M that is <= cap and a multiple of 8 (fallback: M)."""
    for t in range(min(cap, m), 0, -1):
        if m % t == 0 and t % 8 == 0:
            return t
    return m


def _make_conv_stats_kernel(tile_h, width, ci_p, co_p):
    """Pass 1: fused im2col conv (9 tap matmuls) + bias + BN stat accumulation."""
    tile_m = tile_h * width

    def kernel(x_ref, w_ref, b_ref, y_ref, sum_ref, ssq_ref):
        # x_ref  : (1, tile_h+2, width+2, ci_p) bf16 halo'd NHWC block
        # w_ref  : (9, ci_p, co_p) bf16 tap-major weights (resident)
        # b_ref  : (1, co_p) f32 conv bias (resident)
        # y_ref  : (tile_m, co_p) f32 conv+bias output tile
        # sum_ref, ssq_ref: (1, co_p) f32 global accumulators (resident)
        @pl.when(pl.program_id(0) == 0)
        def _init():
            sum_ref[...] = jnp.zeros_like(sum_ref)
            ssq_ref[...] = jnp.zeros_like(ssq_ref)

        x = x_ref[0]  # (tile_h+2, width+2, ci_p)
        acc = jnp.zeros((tile_m, co_p), jnp.float32)
        for kh in range(3):
            for kw in range(3):
                patch = x[kh:kh + tile_h, kw:kw + width, :].reshape(tile_m, ci_p)
                acc = acc + jnp.dot(patch, w_ref[kh * 3 + kw],
                                    preferred_element_type=jnp.float32)
        y = acc + b_ref[...]
        y_ref[...] = y
        sum_ref[...] += jnp.sum(y, axis=0, keepdims=True)
        ssq_ref[...] += jnp.sum(y * y, axis=0, keepdims=True)

    return kernel


def _bn_tanh_kernel(y_ref, scale_ref, shift_ref, o_ref):
    # Pass 2: per-channel affine (folded BN) + tanh. Fully parallel over M.
    o_ref[...] = jnp.tanh(y_ref[...] * scale_ref[...] + shift_ref[...])


def conv_block_tanh(x, w, b, gamma, beta, *, tile_h=None):
    """x: (N, C_in, H, W) NCHW f32; w: (C_out, C_in, 3, 3); b/gamma/beta: (C_out,)."""
    N, C_in, H, W = x.shape
    C_out = w.shape[0]
    assert w.shape == (C_out, C_in, 3, 3), "only 3x3 / stride 1 / pad 1 supported"

    ci_p = _round_up(C_in, 8)      # per-tap contraction dim, sublane aligned
    co_p = _round_up(C_out, 128)   # lane-dense output channels

    if tile_h is None:
        tile_h = _pick_tile_h(H, W)
    assert H % tile_h == 0
    hb = H // tile_h
    tile_m = tile_h * W
    assert tile_m % 8 == 0, "tile_h * W must be a multiple of 8"
    M = N * H * W

    # --- glue: NCHW -> halo'd NHWC row-blocks (bf16), tap-major weights ------
    x_nhwc = jnp.transpose(x, (0, 2, 3, 1)).astype(jnp.float32)
    xp = jnp.pad(x_nhwc, ((0, 0), (1, 1), (1, 1), (0, ci_p - C_in)))
    xh = jnp.stack(
        [xp[:, i * tile_h:i * tile_h + tile_h + 2] for i in range(hb)], axis=1)
    xh = xh.reshape(N * hb, tile_h + 2, W + 2, ci_p).astype(jnp.bfloat16)

    w_taps = jnp.transpose(w, (2, 3, 1, 0)).reshape(9, C_in, C_out)
    w_taps = jnp.pad(
        w_taps, ((0, 0), (0, ci_p - C_in), (0, co_p - C_out))).astype(jnp.bfloat16)
    b_p = jnp.pad(b, (0, co_p - C_out)).reshape(1, co_p).astype(jnp.float32)

    # --- pass 1: conv + bias + global sum / sumsq ----------------------------
    kernel1 = _make_conv_stats_kernel(tile_h, W, ci_p, co_p)
    y_flat, ysum, yssq = pl.pallas_call(
        kernel1,
        grid=(N * hb,),
        in_specs=[
            pl.BlockSpec((1, tile_h + 2, W + 2, ci_p), lambda g: (g, 0, 0, 0)),
            pl.BlockSpec((9, ci_p, co_p), lambda g: (0, 0, 0)),
            pl.BlockSpec((1, co_p), lambda g: (0, 0)),
        ],
        out_specs=(
            pl.BlockSpec((tile_m, co_p), lambda g: (g, 0)),
            pl.BlockSpec((1, co_p), lambda g: (0, 0)),
            pl.BlockSpec((1, co_p), lambda g: (0, 0)),
        ),
        out_shape=(
            jax.ShapeDtypeStruct((M, co_p), jnp.float32),
            jax.ShapeDtypeStruct((1, co_p), jnp.float32),
            jax.ShapeDtypeStruct((1, co_p), jnp.float32),
        ),
        compiler_params=pltpu.CompilerParams(
            dimension_semantics=("arbitrary",),   # carries the BN reduction
            vmem_limit_bytes=_VMEM_LIMIT,
        ),
        cost_estimate=pl.CostEstimate(
            flops=int(2 * M * 9 * ci_p * co_p),
            transcendentals=0,
            bytes_accessed=int(xh.size * 2 + w_taps.size * 2 + M * co_p * 4),
        ),
    )(xh, w_taps, b_p)

    # --- glue: fold batch stats into per-channel scale/shift (f32) -----------
    cnt = jnp.float32(M)
    mean = ysum / cnt
    var = jnp.maximum(yssq / cnt - mean * mean, 0.0)   # biased var (PyTorch BN)
    inv_std = jax.lax.rsqrt(var + BN_EPS)
    gamma_p = jnp.pad(gamma, (0, co_p - C_out)).reshape(1, co_p).astype(jnp.float32)
    beta_p = jnp.pad(beta, (0, co_p - C_out)).reshape(1, co_p).astype(jnp.float32)
    scale = gamma_p * inv_std
    shift = beta_p - mean * scale

    # --- pass 2: normalize + tanh (parallel over M tiles, lane-dense out) ----
    tile_m2 = _pick_tile_m(M, cap=1024)
    out_flat = pl.pallas_call(
        _bn_tanh_kernel,
        grid=(M // tile_m2,),
        in_specs=[
            pl.BlockSpec((tile_m2, co_p), lambda i: (i, 0)),
            pl.BlockSpec((1, co_p), lambda i: (0, 0)),
            pl.BlockSpec((1, co_p), lambda i: (0, 0)),
        ],
        out_specs=pl.BlockSpec((tile_m2, co_p), lambda i: (i, 0)),
        out_shape=jax.ShapeDtypeStruct((M, co_p), jnp.float32),
        compiler_params=pltpu.CompilerParams(
            dimension_semantics=("parallel",),
            vmem_limit_bytes=_VMEM_LIMIT,
        ),
        cost_estimate=pl.CostEstimate(
            flops=int(2 * M * co_p),
            transcendentals=int(M * co_p),
            bytes_accessed=int(2 * M * co_p * 4),
        ),
    )(y_flat, scale, shift)

    # --- back to NCHW, drop channel padding -----------------------------------
    out = out_flat.reshape(N, hb, tile_h, W, co_p)[..., :C_out]
    return out.reshape(N, H, W, C_out).transpose(0, 3, 1, 2)


def _reference(x, w, b, gamma, beta):
    dn = jax.lax.conv_dimension_numbers(x.shape, w.shape, ("NCHW", "OIHW", "NCHW"))
    y = jax.lax.conv_general_dilated(
        x, w, window_strides=(1, 1), padding=((1, 1), (1, 1)), dimension_numbers=dn
    ) + b[None, :, None, None]
    mu = y.mean(axis=(0, 2, 3), keepdims=True)
    var = ((y - mu) ** 2).mean(axis=(0, 2, 3), keepdims=True)
    y_hat = (y - mu) / jnp.sqrt(var + BN_EPS)
    return jnp.tanh(gamma[None, :, None, None] * y_hat + beta[None, :, None, None])


if __name__ == "__main__":
    key = jax.random.PRNGKey(0)
    k_x, k_w, k_b, k_g, k_be = jax.random.split(key, 5)

    N, C_in, H, W = 2, 4, 16, 16
    C_out = 8

    x = jax.random.normal(k_x, (N, C_in, H, W), dtype=jnp.float32)
    w = jax.random.normal(k_w, (C_out, C_in, 3, 3), dtype=jnp.float32) * 0.1
    b = jax.random.normal(k_b, (C_out,), dtype=jnp.float32) * 0.1
    gamma = 1.0 + 0.1 * jax.random.normal(k_g, (C_out,), dtype=jnp.float32)
    beta = 0.1 * jax.random.normal(k_be, (C_out,), dtype=jnp.float32)

    # tile_h=8 -> 2 row-blocks per image: exercises halo blocks and multi-step
    # BN-stat accumulation across the grid.
    out = conv_block_tanh(x, w, b, gamma, beta, tile_h=8)
    out = jax.block_until_ready(out)

    ref = jax.block_until_ready(_reference(x, w, b, gamma, beta))
    assert out.shape == (N, C_out, H, W)
    # bf16 matmul operands (f32 accumulation) -> relaxed tolerance vs f32 ref.
    np.testing.assert_allclose(np.asarray(out), np.asarray(ref), rtol=3e-2, atol=3e-2)

    print("KERNEL_OK")
</pallas_src>

<mosaic_0001>
module attributes {stable_mosaic.version = 11 : i64} {
  func.func @kernel(%arg0: i32, %arg1: memref<1x10x18x8xbf16, #tpu.memory_space<vmem>>, %arg2: memref<9x8x128xbf16, #tpu.memory_space<vmem>>, %arg3: memref<1x128xf32, #tpu.memory_space<vmem>>, %arg4: memref<128x128xf32, #tpu.memory_space<vmem>>, %arg5: memref<1x128xf32, #tpu.memory_space<vmem>>, %arg6: memref<1x128xf32, #tpu.memory_space<vmem>>) attributes {dimension_semantics = [#tpu.dimension_semantics<arbitrary>], iteration_bounds = array<i64: 4>, scalar_prefetch = 0 : i64, scratch_operands = 0 : i64, tpu.core_type = #tpu.core_type<tc>, window_params = [{transform_indices = @transform_0, window_bounds = array<i64: 1, 10, 18, 8>}, {pipeline_mode = #tpu.pipeline_mode<synchronous>, transform_indices = @transform_1, window_bounds = array<i64: 9, 8, 128>}, {pipeline_mode = #tpu.pipeline_mode<synchronous>, transform_indices = @transform_2, window_bounds = array<i64: 1, 128>}, {transform_indices = @transform_3, window_bounds = array<i64: 128, 128>}, {pipeline_mode = #tpu.pipeline_mode<synchronous>, transform_indices = @transform_4, window_bounds = array<i64: 1, 128>}, {pipeline_mode = #tpu.pipeline_mode<synchronous>, transform_indices = @transform_5, window_bounds = array<i64: 1, 128>}]} {
    %c0_i32 = arith.constant 0 : i32
    %0 = arith.cmpi eq, %arg0, %c0_i32 : i32
    %1 = arith.extui %0 : i1 to i32
    %c0_i32_0 = arith.constant 0 : i32
    %2 = arith.cmpi ne, %1, %c0_i32_0 : i32
    scf.if %2 {
      %cst_46 = arith.constant 0.000000e+00 : f32
      %75 = vector.broadcast %cst_46 : f32 to vector<1x128xf32>
      %c0_47 = arith.constant 0 : index
      %c0_48 = arith.constant 0 : index
      %76 = vector.load %arg5[%c0_47, %c0_48] : memref<1x128xf32, #tpu.memory_space<vmem>>, vector<1x128xf32>
      tpu.vector_store %arg5[%c0_47, %c0_48], %75 {strides = array<i32>} : memref<1x128xf32, #tpu.memory_space<vmem>>, vector<1x128xf32>,
      %cst_49 = arith.constant 0.000000e+00 : f32
      %77 = vector.broadcast %cst_49 : f32 to vector<1x128xf32>
      %c0_50 = arith.constant 0 : index
      %c0_51 = arith.constant 0 : index
      %78 = vector.load %arg6[%c0_50, %c0_51] : memref<1x128xf32, #tpu.memory_space<vmem>>, vector<1x128xf32>
      tpu.vector_store %arg6[%c0_50, %c0_51], %77 {strides = array<i32>} : memref<1x128xf32, #tpu.memory_space<vmem>>, vector<1x128xf32>,
    } else {
    }
    %c0 = arith.constant 0 : index
    %c0_1 = arith.constant 0 : index
    %c0_2 = arith.constant 0 : index
    %c0_3 = arith.constant 0 : index
    %3 = vector.load %arg1[%c0, %c0_1, %c0_2, %c0_3] : memref<1x10x18x8xbf16, #tpu.memory_space<vmem>>, vector<1x10x18x8xbf16>
    %4 = vector.shape_cast %3 : vector<1x10x18x8xbf16> to vector<10x18x8xbf16>
    %cst = arith.constant 0.000000e+00 : f32
    %5 = vector.broadcast %cst : f32 to vector<128x128xf32>
    %6 = vector.extract_strided_slice %4 {offsets = [0, 0, 0], sizes = [8, 16, 8], strides = [1, 1, 1]} : vector<10x18x8xbf16> to vector<8x16x8xbf16>
    %7 = vector.shape_cast %6 : vector<8x16x8xbf16> to vector<128x8xbf16>
    %c0_4 = arith.constant 0 : index
    %c0_5 = arith.constant 0 : index
    %c0_6 = arith.constant 0 : index
    %8 = vector.load %arg2[%c0_4, %c0_5, %c0_6] : memref<9x8x128xbf16, #tpu.memory_space<vmem>>, vector<1x8x128xbf16>
    %9 = vector.shape_cast %8 : vector<1x8x128xbf16> to vector<8x128xbf16>
    %cst_7 = arith.constant dense<0.000000e+00> : vector<128x128xf32>
    %10 = tpu.matmul %7, %9, %cst_7 {dimension_numbers = #tpu.dot_dimension_numbers<[1], [0], [0], [1], [0, 0, 1, 1], [], []>} : vector<128x8xbf16>, vector<8x128xbf16>, vector<128x128xf32> -> vector<128x128xf32>
    %11 = arith.addf %5, %10 : vector<128x128xf32>
    %12 = vector.extract_strided_slice %4 {offsets = [0, 1, 0], sizes = [8, 16, 8], strides = [1, 1, 1]} : vector<10x18x8xbf16> to vector<8x16x8xbf16>
    %13 = vector.shape_cast %12 : vector<8x16x8xbf16> to vector<128x8xbf16>
    %c1 = arith.constant 1 : index
    %c0_8 = arith.constant 0 : index
    %c0_9 = arith.constant 0 : index
    %14 = vector.load %arg2[%c1, %c0_8, %c0_9] : memref<9x8x128xbf16, #tpu.memory_space<vmem>>, vector<1x8x128xbf16>
    %15 = vector.shape_cast %14 : vector<1x8x128xbf16> to vector<8x128xbf16>
    %cst_10 = arith.constant dense<0.000000e+00> : vector<128x128xf32>
    %16 = tpu.matmul %13, %15, %cst_10 {dimension_numbers = #tpu.dot_dimension_numbers<[1], [0], [0], [1], [0, 0, 1, 1], [], []>} : vector<128x8xbf16>, vector<8x128xbf16>, vector<128x128xf32> -> vector<128x128xf32>
    %17 = arith.addf %11, %16 : vector<128x128xf32>
    %18 = vector.extract_strided_slice %4 {offsets = [0, 2, 0], sizes = [8, 16, 8], strides = [1, 1, 1]} : vector<10x18x8xbf16> to vector<8x16x8xbf16>
    %19 = vector.shape_cast %18 : vector<8x16x8xbf16> to vector<128x8xbf16>
    %c2 = arith.constant 2 : index
    %c0_11 = arith.constant 0 : index
    %c0_12 = arith.constant 0 : index
    %20 = vector.load %arg2[%c2, %c0_11, %c0_12] : memref<9x8x128xbf16, #tpu.memory_space<vmem>>, vector<1x8x128xbf16>
    %21 = vector.shape_cast %20 : vector<1x8x128xbf16> to vector<8x128xbf16>
    %cst_13 = arith.constant dense<0.000000e+00> : vector<128x128xf32>
    %22 = tpu.matmul %19, %21, %cst_13 {dimension_numbers = #tpu.dot_dimension_numbers<[1], [0], [0], [1], [0, 0, 1, 1], [], []>} : vector<128x8xbf16>, vector<8x128xbf16>, vector<128x128xf32> -> vector<128x128xf32>
    %23 = arith.addf %17, %22 : vector<128x128xf32>
    %24 = vector.extract_strided_slice %4 {offsets = [1, 0, 0], sizes = [8, 16, 8], strides = [1, 1, 1]} : vector<10x18x8xbf16> to vector<8x16x8xbf16>
    %25 = vector.shape_cast %24 : vector<8x16x8xbf16> to vector<128x8xbf16>
    %c3 = arith.constant 3 : index
    %c0_14 = arith.constant 0 : index
    %c0_15 = arith.constant 0 : index
    %26 = vector.load %arg2[%c3, %c0_14, %c0_15] : memref<9x8x128xbf16, #tpu.memory_space<vmem>>, vector<1x8x128xbf16>
    %27 = vector.shape_cast %26 : vector<1x8x128xbf16> to vector<8x128xbf16>
    %cst_16 = arith.constant dense<0.000000e+00> : vector<128x128xf32>
    %28 = tpu.matmul %25, %27, %cst_16 {dimension_numbers = #tpu.dot_dimension_numbers<[1], [0], [0], [1], [0, 0, 1, 1], [], []>} : vector<128x8xbf16>, vector<8x128xbf16>, vector<128x128xf32> -> vector<128x128xf32>
    %29 = arith.addf %23, %28 : vector<128x128xf32>
    %30 = vector.extract_strided_slice %4 {offsets = [1, 1, 0], sizes = [8, 16, 8], strides = [1, 1, 1]} : vector<10x18x8xbf16> to vector<8x16x8xbf16>
    %31 = vector.shape_cast %30 : vector<8x16x8xbf16> to vector<128x8xbf16>
    %c4 = arith.constant 4 : index
    %c0_17 = arith.constant 0 : index
    %c0_18 = arith.constant 0 : index
    %32 = vector.load %arg2[%c4, %c0_17, %c0_18] : memref<9x8x128xbf16, #tpu.memory_space<vmem>>, vector<1x8x128xbf16>
    %33 = vector.shape_cast %32 : vector<1x8x128xbf16> to vector<8x128xbf16>
    %cst_19 = arith.constant dense<0.000000e+00> : vector<128x128xf32>
    %34 = tpu.matmul %31, %33, %cst_19 {dimension_numbers = #tpu.dot_dimension_numbers<[1], [0], [0], [1], [0, 0, 1, 1], [], []>} : vector<128x8xbf16>, vector<8x128xbf16>, vector<128x128xf32> -> vector<128x128xf32>
    %35 = arith.addf %29, %34 : vector<128x128xf32>
    %36 = vector.extract_strided_slice %4 {offsets = [1, 2, 0], sizes = [8, 16, 8], strides = [1, 1, 1]} : vector<10x18x8xbf16> to vector<8x16x8xbf16>
    %37 = vector.shape_cast %36 : vector<8x16x8xbf16> to vector<128x8xbf16>
    %c5 = arith.constant 5 : index
    %c0_20 = arith.constant 0 : index
    %c0_21 = arith.constant 0 : index
    %38 = vector.load %arg2[%c5, %c0_20, %c0_21] : memref<9x8x128xbf16, #tpu.memory_space<vmem>>, vector<1x8x128xbf16>
    %39 = vector.shape_cast %38 : vector<1x8x128xbf16> to vector<8x128xbf16>
    %cst_22 = arith.constant dense<0.000000e+00> : vector<128x128xf32>
    %40 = tpu.matmul %37, %39, %cst_22 {dimension_numbers = #tpu.dot_dimension_numbers<[1], [0], [0], [1], [0, 0, 1, 1], [], []>} : vector<128x8xbf16>, vector<8x128xbf16>, vector<128x128xf32> -> vector<128x128xf32>
    %41 = arith.addf %35, %40 : vector<128x128xf32>
    %42 = vector.extract_strided_slice %4 {offsets = [2, 0, 0], sizes = [8, 16, 8], strides = [1, 1, 1]} : vector<10x18x8xbf16> to vector<8x16x8xbf16>
    %43 = vector.shape_cast %42 : vector<8x16x8xbf16> to vector<128x8xbf16>
    %c6 = arith.constant 6 : index
    %c0_23 = arith.constant 0 : index
    %c0_24 = arith.constant 0 : index
    %44 = vector.load %arg2[%c6, %c0_23, %c0_24] : memref<9x8x128xbf16, #tpu.memory_space<vmem>>, vector<1x8x128xbf16>
    %45 = vector.shape_cast %44 : vector<1x8x128xbf16> to vector<8x128xbf16>
    %cst_25 = arith.constant dense<0.000000e+00> : vector<128x128xf32>
    %46 = tpu.matmul %43, %45, %cst_25 {dimension_numbers = #tpu.dot_dimension_numbers<[1], [0], [0], [1], [0, 0, 1, 1], [], []>} : vector<128x8xbf16>, vector<8x128xbf16>, vector<128x128xf32> -> vector<128x128xf32>
    %47 = arith.addf %41, %46 : vector<128x128xf32>
    %48 = vector.extract_strided_slice %4 {offsets = [2, 1, 0], sizes = [8, 16, 8], strides = [1, 1, 1]} : vector<10x18x8xbf16> to vector<8x16x8xbf16>
    %49 = vector.shape_cast %48 : vector<8x16x8xbf16> to vector<128x8xbf16>
    %c7 = arith.constant 7 : index
    %c0_26 = arith.constant 0 : index
    %c0_27 = arith.constant 0 : index
    %50 = vector.load %arg2[%c7, %c0_26, %c0_27] : memref<9x8x128xbf16, #tpu.memory_space<vmem>>, vector<1x8x128xbf16>
    %51 = vector.shape_cast %50 : vector<1x8x128xbf16> to vector<8x128xbf16>
    %cst_28 = arith.constant dense<0.000000e+00> : vector<128x128xf32>
    %52 = tpu.matmul %49, %51, %cst_28 {dimension_numbers = #tpu.dot_dimension_numbers<[1], [0], [0], [1], [0, 0, 1, 1], [], []>} : vector<128x8xbf16>, vector<8x128xbf16>, vector<128x128xf32> -> vector<128x128xf32>
    %53 = arith.addf %47, %52 : vector<128x128xf32>
    %54 = vector.extract_strided_slice %4 {offsets = [2, 2, 0], sizes = [8, 16, 8], strides = [1, 1, 1]} : vector<10x18x8xbf16> to vector<8x16x8xbf16>
    %55 = vector.shape_cast %54 : vector<8x16x8xbf16> to vector<128x8xbf16>
    %c8 = arith.constant 8 : index
    %c0_29 = arith.constant 0 : index
    %c0_30 = arith.constant 0 : index
    %56 = vector.load %arg2[%c8, %c0_29, %c0_30] : memref<9x8x128xbf16, #tpu.memory_space<vmem>>, vector<1x8x128xbf16>
    %57 = vector.shape_cast %56 : vector<1x8x128xbf16> to vector<8x128xbf16>
    %cst_31 = arith.constant dense<0.000000e+00> : vector<128x128xf32>
    %58 = tpu.matmul %55, %57, %cst_31 {dimension_numbers = #tpu.dot_dimension_numbers<[1], [0], [0], [1], [0, 0, 1, 1], [], []>} : vector<128x8xbf16>, vector<8x128xbf16>, vector<128x128xf32> -> vector<128x128xf32>
    %59 = arith.addf %53, %58 : vector<128x128xf32>
    %c0_32 = arith.constant 0 : index
    %c0_33 = arith.constant 0 : index
    %60 = vector.load %arg3[%c0_32, %c0_33] : memref<1x128xf32, #tpu.memory_space<vmem>>, vector<1x128xf32>
    %61 = vector.broadcast %60 : vector<1x128xf32> to vector<128x128xf32>
    %62 = arith.addf %59, %61 : vector<128x128xf32>
    %c0_34 = arith.constant 0 : index
    %c0_35 = arith.constant 0 : index
    %63 = vector.load %arg4[%c0_34, %c0_35] : memref<128x128xf32, #tpu.memory_space<vmem>>, vector<128x128xf32>
    tpu.vector_store %arg4[%c0_34, %c0_35], %62 {strides = array<i32>} : memref<128x128xf32, #tpu.memory_space<vmem>>, vector<128x128xf32>,
    %c0_36 = arith.constant 0 : index
    %c0_37 = arith.constant 0 : index
    %64 = vector.load %arg5[%c0_36, %c0_37] : memref<1x128xf32, #tpu.memory_space<vmem>>, vector<1x128xf32>
    %cst_38 = arith.constant dense<0.000000e+00> : vector<128xf32>
    %65 = vector.multi_reduction <add>, %62, %cst_38 [0] : vector<128x128xf32> to vector<128xf32>
    %66 = vector.shape_cast %65 : vector<128xf32> to vector<1x128xf32>
    %67 = arith.addf %64, %66 : vector<1x128xf32>
    %c0_39 = arith.constant 0 : index
    %c0_40 = arith.constant 0 : index
    %68 = vector.load %arg5[%c0_39, %c0_40] : memref<1x128xf32, #tpu.memory_space<vmem>>, vector<1x128xf32>
    tpu.vector_store %arg5[%c0_39, %c0_40], %67 {strides = array<i32>} : memref<1x128xf32, #tpu.memory_space<vmem>>, vector<1x128xf32>,
    %c0_41 = arith.constant 0 : index
    %c0_42 = arith.constant 0 : index
    %69 = vector.load %arg6[%c0_41, %c0_42] : memref<1x128xf32, #tpu.memory_space<vmem>>, vector<1x128xf32>
    %70 = arith.mulf %62, %62 : vector<128x128xf32>
    %cst_43 = arith.constant dense<0.000000e+00> : vector<128xf32>
    %71 = vector.multi_reduction <add>, %70, %cst_43 [0] : vector<128x128xf32> to vector<128xf32>
    %72 = vector.shape_cast %71 : vector<128xf32> to vector<1x128xf32>
    %73 = arith.addf %69, %72 : vector<1x128xf32>
    %c0_44 = arith.constant 0 : index
    %c0_45 = arith.constant 0 : index
    %74 = vector.load %arg6[%c0_44, %c0_45] : memref<1x128xf32, #tpu.memory_space<vmem>>, vector<1x128xf32>
    tpu.vector_store %arg6[%c0_44, %c0_45], %73 {strides = array<i32>} : memref<1x128xf32, #tpu.memory_space<vmem>>, vector<1x128xf32>,
    return
  }
  func.func @transform_0(%arg0: i32) -> (i32, i32, i32, i32) {
    %c0_i32 = arith.constant 0 : i32
    %c0_i32_0 = arith.constant 0 : i32
    %c0_i32_1 = arith.constant 0 : i32
    %c0_i32_2 = arith.constant 0 : i32
    return %arg0, %c0_i32, %c0_i32_0, %c0_i32_1 : i32, i32, i32, i32
  }
  func.func @transform_1(%arg0: i32) -> (i32, i32, i32) {
    %c0_i32 = arith.constant 0 : i32
    %c0_i32_0 = arith.constant 0 : i32
    %c0_i32_1 = arith.constant 0 : i32
    %c0_i32_2 = arith.constant 0 : i32
    return %c0_i32, %c0_i32_0, %c0_i32_1 : i32, i32, i32
  }
  func.func @transform_2(%arg0: i32) -> (i32, i32) {
    %c0_i32 = arith.constant 0 : i32
    %c0_i32_0 = arith.constant 0 : i32
    %c0_i32_1 = arith.constant 0 : i32
    return %c0_i32, %c0_i32_0 : i32, i32
  }
  func.func @transform_3(%arg0: i32) -> (i32, i32) {
    %c0_i32 = arith.constant 0 : i32
    %c0_i32_0 = arith.constant 0 : i32
    return %arg0, %c0_i32 : i32, i32
  }
  func.func @transform_4(%arg0: i32) -> (i32, i32) {
    %c0_i32 = arith.constant 0 : i32
    %c0_i32_0 = arith.constant 0 : i32
    %c0_i32_1 = arith.constant 0 : i32
    return %c0_i32, %c0_i32_0 : i32, i32
  }
  func.func @transform_5(%arg0: i32) -> (i32, i32) {
    %c0_i32 = arith.constant 0 : i32
    %c0_i32_0 = arith.constant 0 : i32
    %c0_i32_1 = arith.constant 0 : i32
    return %c0_i32, %c0_i32_0 : i32, i32
  }
}

</mosaic_0001>

<bundles_post_ra>
// kernel: tpu_custom_call.1
= control target key start
LH: loop header
LB: loop body
LE: loop exit
PB: predicated region body
PF: predicated region fallthrough
CT: control target
= control target key end

     0   :  { %11 = vsyncpa [#allocation3], 0  ;;  %s3505_s0 = inlined_call_operand.vmem [shape: bf16[4,10,18,8], index: 0, kind: input, shape index: {}]   ;;  %s3506_s1 = inlined_call_operand.vmem [shape: bf16[9,8,128], index: 1, kind: input, shape index: {}]   ;;  %s3507_s2 = inlined_call_operand.vmem [shape: f32[1,128], index: 2, kind: input, shape index: {}]   ;;  %s3508_s3 = inlined_call_operand.hbm [shape: f32[512,128], index: 3, kind: output, shape index: {0}]   ;;  %s3509_s4 = inlined_call_operand.hbm [shape: f32[1,128], index: 4, kind: output, shape index: {1}]   ;;  %s3510_s5 = inlined_call_operand.hbm [shape: f32[1,128], index: 5, kind: output, shape index: {2}]  }
   0x1   :  { %13 = vsyncpa [#allocation3 + $0x1], 0 }
   0x2   :  { %14 = vsyncpa [#allocation5], 0  ;;  %s2780_s18 = smov 0   ;;  %s2782_s19 = smov 0  }
   0x3   :  { %s2784_s20 = smov 0   ;;  %s2786_s21 = smov 0  }
   0x4 LB: > { %s2801_s22 = sadd.s32 4294967295, %s2742_s21   ;;  %s2036_s23 = sadd.s32 4294967294, %s2742_s21   ;;  %s2742_s21 = sphi %s2786_s21, %s3520_s21   ;;  %s2738_s20 = sphi %s2784_s20, %s3519_s20   ;;  %s2734_s19 = sphi %s2782_s19, %s3518_s19   ;;  %s2730_s18 = sphi %s2780_s18, %s3517_s18  }
   0x5   : > { %s2805_s24 = sadd.s32 1, %s2742_s21   ;;  %s95_s25 = sadd.s32 1, %s2738_s20 }
   0x6   : > { %s92_s26 = ssub.s32 %s2742_s21, %s2805_s24  ;;  %p105_p0 = scmp.ne.s32.totalorder %s2738_s20, %s2734_s19 }
   0x7   : > { %p93_p1 = scmp.eq.s32.totalorder %s92_s26, 0  ;;  %p106_p2 = scmp.eq.s32.totalorder %s2801_s22, 3 }
   0x8   : > { %p111_p3 = scmp.ne.s32.totalorder %s2734_s19, %s2730_s18  ;;  %p112_p4 = scmp.eq.s32.totalorder %s2036_s23, 3 }
   0x9   : > { %s2816_s27 = scalar_select %p93_p1, %s2738_s20, %s95_s25  }
   0xa   : > { %p2820_p5 = por %p106_p2, %p105_p0  ;;  %p2824_p6 = por %p112_p4, %p111_p3 }
   0xb   : > { %p2039_p7 = scmp.ge.s32.totalorder %s2742_s21, 1  ;;  %p186_p8 = scmp.lt.s32.totalorder %s2742_s21, 5 }
   0xd   : > { %p187_p9 = pnand %p2039_p7, %p186_p8 }
   0xe   : > { %s207_s30 = sand.u32 (!%p187_p9), 1, %s2734_s19   ;;  %p214_p10 = scmp.lt.s32.totalorder (!%p187_p9), %s2801_s22, 3 }
   0xf   : > { %190 = sbr.rel (%p187_p9) target bundleno = 478 (0x1de), region = 32  ;;  %s2040_s6 = sshll.u32 (!%p187_p9), %s207_s30, 7 }
  0x10   : > { %s2840_s12 = scalar_lea.vmem (!%p187_p9), [#allocation2], %s2040_s6  ;;  %p2042_p11 = scmp.ne.s32.totalorder (!%p187_p9), %s2801_s22, 0 }
  0x16   : > { %s215_s7 = scalar_select %p214_p10, %s2801_s22, 3 }
  0x17   : > { %224 = sbr.rel (%p2042_p11) target bundleno = 30 (0x1e), region = 36  ;;  %v2744_v0 = vmov (!%p2042_p11), 0.0  }
  0x18   : > { %s2557_s8 = smul.u32 120, %s215_s7  ;;  %225 = vst [vmem:[#allocation4] sm:$0x1] (!%p2042_p11), %v2744_v0  ;;  %226 = vst [vmem:[#allocation6] sm:$0x1] (!%p2042_p11), %v2744_v0 }
  0x1a   : > { %s2838_s11 = scalar_lea.vmem %s3505_s0, %s2557_s8 }
  0x1e PF: > { %v2043_v1 = vld [vmem:[%s3506_s1 + $0x4] sm:$0xf]  ;;  %vm504_vm0 = vcmask 1043456   ;;  %v2849_v2 = vld [vmem:[%s3506_s1 + $0x10] sm:$0xf]  ;;  %vm479_vm4 = vcmask 64512  }
  0x1f   : > { %2547 = vmatprep.subr.msk.bf16.mxu1 %vm504_vm0, %v2043_v1  ;;  %2551 = vmatprep.subr.msk.bf16.mxu0 %vm504_vm0, %v2849_v2  ;;  %v506_v3 = vsel %vm504_vm0, %v2043_v1, 0  ;;  %v2857_v4 = vsel %vm504_vm0, %v2849_v2, 0  ;;  %v2860_v5 = vld [vmem:[%s2838_s11] sm:$0xf]  ;;  %v2863_v6 = vld [vmem:[%s2838_s11 + $0x4] sm:$0xf] }
  0x20   : > { %2256 = vmatpush3.bf16.msra.mxu1 %v506_v3  ;;  %2328 = vmatpush3.bf16.msra.mxu0 %v2857_v4  ;;  %v2867_v7 = vld [vmem:[%s2838_s11 + $0x8] sm:$0x1]  ;;  %vm258_vm1 = vsmask.f32 3328  ;;  %vm259_vm2 = vsmask.f32 7440 }
  0x21   : > { %v262_v8 = vshrl.u32 %v2860_v5, 16  ;;  %v265_v9 = vshll.u32 %v2860_v5, 16  ;;  %v271_v10 = vshll.u32 %v2863_v6, 16  ;;  %v275_v11 = vshrl.u32 %v2863_v6, 16  ;;  %v257_v12 = vld [vmem:[%s3506_s1] sm:$0xf]  ;;  %vm2901_vm3 = vmor %vm258_vm1, %vm259_vm2 }
  0x22   : > { %v281_v13 = vshll.u32 %v2867_v7, 16  ;;  %2548 = vmatprep.subr.msk.bf16.mxu1 %vm504_vm0, %v257_v12  ;;  %v2879_v14 = vld [vmem:[%s2838_s11 + $0xc] sm:$0xf]  ;;  %v2882_v15 = vld [vmem:[%s2838_s11 + $0x10] sm:$0xf]  ;;  %v670_v42 = vsel %vm504_vm0, %v257_v12, 0 }
  0x23   : > { %v264_v16 = vrot.slane %v262_v8, 4  ;;  %v267_v17 = vrot.slane %v265_v9, 5  ;;  %v273_v18 = vrot.slane %v271_v10, 5  ;;  %v277_v19 = vrot.slane %v275_v11, 4  ;;  %v2885_v20 = vld [vmem:[%s2838_s11 + $0x14] sm:$0x1] }
  0x24   : > { %v283_v21 = vrot.slane %v281_v13, 5  ;;  %v286_v22 = vshrl.u32 %v2879_v14, 16  ;;  %v289_v23 = vshll.u32 %v2879_v14, 16  ;;  %v295_v24 = vshll.u32 %v2882_v15, 16  ;;  %v2122_v25 = vld [vmem:[%s3506_s1 + $0x14] sm:$0xf] }
  0x25   : > { %v268_v26 = vor.u32 %v267_v17, %v264_v16  ;;  %v278_v27 = vor.u32 %v277_v19, %v273_v18  ;;  %v299_v28 = vshrl.u32 %v2882_v15, 16  ;;  %v305_v29 = vshll.u32 %v2885_v20, 16  ;;  %2553 = vmatprep.subr.msk.bf16.mxu0 %vm504_vm0, %v2122_v25  ;;  %v2897_v30 = vld [vmem:[%s2838_s11 + $0x18] sm:$0xf]  ;;  %v2906_v39 = vld [vmem:[%s2838_s11 + $0x1c] sm:$0xf] }
  0x26   : > { %v288_v32 = vrot.slane %v286_v22, 4  ;;  %v291_v33 = vrot.slane %v289_v23, 5  ;;  %v297_v34 = vrot.slane %v295_v24, 5  ;;  %v792_v41 = vrot.slane %v2885_v20, 5  ;;  %v2911_v43 = vld [vmem:[%s2838_s11 + $0x20] sm:$0x1] }
  0x27   : > { %v269_v35 = vrot.slane %v268_v26, 4  ;;  %v279_v36 = vrot.slane %v278_v27, 4  ;;  %v301_v37 = vrot.slane %v299_v28, 4  ;;  %v307_v38 = vrot.slane %v305_v29, 5  ;;  %v2923_v57 = vld [vmem:[%s2838_s11 + $0x24] sm:$0xf] }
  0x28   : > { %v292_v40 = vor.u32 %v291_v33, %v288_v32  ;;  %v310_v44 = vshrl.u32 %v2897_v30, 16  ;;  %v313_v48 = vshll.u32 %v2897_v30, 16  ;;  %v319_v52 = vshll.u32 %v2906_v39, 16  ;;  %v2931_v62 = vld [vmem:[%s2838_s11 + $0x28] sm:$0xf]  ;;  %s2173_s25 = sshll.u32 %s2801_s22, 11 }
  0x29   : > { %v274_v45 = vsel %vm2901_vm3, %v269_v35, %v273_v18  ;;  %v284_v46 = vsel %vm2901_vm3, %v279_v36, %v283_v21  ;;  %v302_v47 = vor.u32 %v301_v37, %v297_v34  ;;  %v323_v55 = vshrl.u32 %v2906_v39, 16  ;;  %v2936_v8 = vld [vmem:[%s2838_s11 + $0x2c] sm:$0x1]  ;;  %v2939_v9 = vld [vmem:[%s2838_s11 + $0x30] sm:$0xf]  ;;  %s1931_s26 = sshll.u32 %s2840_s12, 4  ;;  %s3406_s8 = scalar_lea.hbm %s3508_s3, %s2173_s25  ;;  %s3408_s26 = int_to_ptr.vmem [resolvable:$true] %s1931_s26 }
  0x2a   : > { %v2044_v49 = vcombine.low %v274_v45, %v284_v46  ;;  %v293_v50 = vrot.slane %v292_v40, 4  ;;  %v312_v51 = vrot.slane %v310_v44, 4  ;;  %v315_v54 = vrot.slane %v313_v48, 5  ;;  %v2950_v24 = vld [vmem:[%s2838_s11 + $0x34] sm:$0xf]  ;;  %s3416_s9 = scalar_lea.sflag [#allocation3], %s207_s30 }
  0x2b   : > { %v303_v53 = vrot.slane %v302_v47, 4  ;;  %v329_v56 = vshll.u32 %v2911_v43, 16  ;;  %v321_v59 = vrot.slane %v319_v52, 5  ;;  %v796_v60 = vrot.slane %v2906_v39, 5  ;;  %v2956_v32 = vld [vmem:[%s2838_s11 + $0x38] sm:$0x1] }
  0x2c   : > { %2257 = vmatprep.mubr.msk.bf16.mxu1 %vm479_vm4, %v2044_v49  ;;  %v298_v58 = vsel %vm2901_vm3, %v293_v50, %v297_v34  ;;  %v799_v61 = vrot.slane %v2911_v43, 5  ;;  %v316_v0 = vor.u32 %v315_v54, %v312_v51  ;;  %v325_v1 = vrot.slane %v323_v55, 4  ;;  %v2132_v44 = vld [vmem:[%s3506_s1 + $0x18] sm:$0xf]  ;;  %v2972_v49 = vld [vmem:[%s3506_s1 + $0x8] sm:$0xf] }
  0x2d   : > { %v308_v63 = vsel %vm2901_vm3, %v303_v53, %v307_v38  ;;  %v331_v3 = vrot.slane %v329_v56, 5  ;;  %v1293_v11 = vsel %vm504_vm0, %v2122_v25, 0  ;;  %v334_v12 = vshrl.u32 %v2923_v57, 16  ;;  %v2975_v53 = vld [vmem:[%s2838_s11 + $0x3c] sm:$0xf]  ;;  %s2624_s10 = scalar_lea.vmem %s3408_s26, 2048 }
  0x2e   : > { %v2045_v10 = vcombine.low %v298_v58, %v308_v63  ;;  %v337_v13 = vshll.u32 %v2923_v57, 16  ;;  %v317_v16 = vrot.slane %v316_v0, 4  ;;  %v326_v17 = vor.u32 %v325_v1, %v321_v59  ;;  %v2986_v58 = vld [vmem:[%s2838_s11 + $0x40] sm:$0xf]  ;;  %p2625_p12 = scmp.ne.s32.totalorder %s3408_s26, %s2624_s10  ;;  %s2745_s13 = smov [#allocation2]  }
  0x2f   : > { %v343_v18 = vshll.u32 %v2931_v62, 16  ;;  %v347_v19 = vshrl.u32 %v2931_v62, 16  ;;  %v336_v21 = vrot.slane %v334_v12, 4  ;;  %v353_v23 = vshll.u32 %v2936_v8, 16  ;;  %s2628_s14 = sshll.u32 %s2745_s13, 4  ;;  %s2629_s14 = int_to_ptr.vmem [resolvable:$false] %s2628_s14 }
  0x30   : > { %2329 = vmatprep.mubr.msk.bf16.mxu0 %vm479_vm4, %v2045_v10  ;;  %2258 = vmatmul.mubr.msk.bf16.vlgmr.msra.gmra.mrb[0].mxu1 %vm479_vm4, %v2045_v10  ;;  %v339_v22 = vrot.slane %v337_v13, 5  ;;  %v358_v25 = vshrl.u32 %v2939_v9, 16  ;;  %v322_v26 = vsel %vm2901_vm3, %v317_v16, %v321_v59  ;;  %v327_v27 = vrot.slane %v326_v17, 4  ;;  %v3000_v13 = vld [vmem:[%s2838_s11 + $0x44] sm:$0x1]  ;;  %p2626_p13 = pnand %p2625_p12, %p2820_p5  ;;  %s2630_s15 = scalar_lea.vmem %s2629_s14, 4096 }
  0x31   : > { %2274 = vmatpush3.bf16.msra.mxu1 %v670_v42  ;;  %v345_v28 = vrot.slane %v343_v18, 5  ;;  %v349_v29 = vrot.slane %v347_v19, 4  ;;  %v355_v34 = vrot.slane %v353_v23, 5  ;;  %v361_v36 = vshll.u32 %v2939_v9, 16  ;;  %p2631_p1 = scmp.lt.s32.totalorder %s3408_s26, %s2629_s14  ;;  %p2632_p3 = scmp.lt.s32.totalorder %s2630_s15, %s2624_s10 }
  0x32   : > { %v340_v33 = vor.u32 %v339_v22, %v336_v21  ;;  %v360_v35 = vrot.slane %v358_v25, 4  ;;  %v332_v37 = vsel %vm2901_vm3, %v327_v27, %v331_v3  ;;  %v367_v40 = vshll.u32 %v2950_v24, 16  ;;  %2549 = vmatprep.subr.msk.bf16.mxu1 %vm504_vm0, %v2972_v49  ;;  %p2627_p0 = pneg %p2626_p13 }
  0x33   : > { %v350_v38 = vor.u32 %v349_v29, %v345_v28  ;;  %v371_v42 = vshrl.u32 %v2950_v24, 16  ;;  %v2966_v45 = vcombine.low %v322_v26, %v332_v37  ;;  %v363_v47 = vrot.slane %v361_v36, 5  ;;  %p2633_p4 = por %p2632_p3, %p2631_p1 }
  0x34   : > { %v341_v46 = vrot.slane %v340_v33, 4  ;;  %v377_v48 = vshll.u32 %v2956_v32, 16  ;;  %v369_v51 = vrot.slane %v367_v40, 5  ;;  %vm777_vm5 = vcmask 1042432   ;;  %v3029_v40 = vld [vmem:[%s2838_s11 + $0x4c] sm:$0xf] }
  0x35   : > { %v351_v50 = vrot.slane %v350_v38, 4  ;;  %v373_v52 = vrot.slane %v371_v42, 4  ;;  %2330 = vmatmul.mubr.msk.bf16.vlgmr.msra.gmra.mrb[0].mxu0 %vm479_vm4, %v2966_v45  ;;  %2261 = vmatprep.mubr.msk.bf16.mxu1 %vm479_vm4, %v2966_v45  ;;  %v364_v55 = vor.u32 %v363_v47, %v360_v35  ;;  %vm778_vm6 = vcmask 1046532   ;;  %p2634_p7 = pnand %p2633_p4, %p2627_p0 }
  0x36   : > { %v346_v54 = vsel %vm2901_vm3, %v341_v46, %v345_v28  ;;  %v379_v56 = vrot.slane %v377_v48, 5  ;;  %2346 = vmatpush3.bf16.msra.mxu0 %v1293_v11  ;;  %vm2990_vm7 = vmor %vm777_vm5, %vm778_vm6  ;;  %v2077_v1 = vrot.slane %v2879_v14, 9  ;;  %v789_v3 = vrot.slane %v2882_v15, 5 }
  0x37   : > { %v356_v59 = vsel %vm2901_vm3, %v351_v50, %v355_v34  ;;  %v374_v63 = vor.u32 %v373_v52, %v369_v51  ;;  %v365_v12 = vrot.slane %v364_v55, 4  ;;  %2554 = vmatprep.subr.msk.bf16.mxu0 %vm504_vm0, %v2132_v44  ;;  %v382_v11 = vshrl.u32 %v2975_v53, 16  ;;  %v3022_v34 = vld [vmem:[%s2838_s11 + $0x48] sm:$0xf]  ;;  %v3040_v50 = vld [vmem:[%s2838_s11 + $0x50] sm:$0x1] }
  0x38   : > { %v2996_v10 = vcombine.low %v346_v54, %v356_v59  ;;  %v385_v16 = vshll.u32 %v2975_v53, 16  ;;  %v790_v18 = vsel %vm2990_vm7, %v2077_v1, %v789_v3  ;;  %v791_v19 = vrot.slane %v789_v3, 4 }
  0x39   : > { %v375_v17 = vrot.slane %v374_v63, 4  ;;  %v391_v21 = vshll.u32 %v2986_v58, 16  ;;  %v370_v22 = vsel %vm2901_vm3, %v365_v12, %v369_v51  ;;  %v384_v23 = vrot.slane %v382_v11, 4 }
  0x3a   : > { %2333 = vmatprep.mubr.msk.bf16.mxu0 %vm479_vm4, %v2996_v10  ;;  %2262 = vmatmul.mubr.msk.bf16.gmra.mrb[4].mxu1 %vm479_vm4, %v2996_v10  ;;  %v387_v25 = vrot.slane %v385_v16, 5  ;;  %v395_v26 = vshrl.u32 %v2986_v58, 16  ;;  %v793_v28 = vsel %vm2990_vm7, %v791_v19, %v792_v41  ;;  %v401_v33 = vshll.u32 %v3000_v13, 16  ;;  %v3062_v16 = vld [vmem:[%s2838_s11 + $0x54] sm:$0xf] }
  0x3b   : > { %v380_v27 = vsel %vm2901_vm3, %v375_v17, %v379_v56  ;;  %v393_v29 = vrot.slane %v391_v21, 5  ;;  %v3026_v36 = vcombine.low %v790_v18, %v793_v28  ;;  %v2078_v20 = vrot.slane %v2897_v30, 9  ;;  %v3070_v21 = vld [vmem:[%s2838_s11 + $0x58] sm:$0xf] }
  0x3c   : > { %v3024_v35 = vcombine.low %v370_v22, %v380_v27  ;;  %v388_v37 = vor.u32 %v387_v25, %v384_v23  ;;  %v397_v38 = vrot.slane %v395_v26, 4  ;;  %v403_v42 = vrot.slane %v401_v33, 5  ;;  %v3075_v27 = vld [vmem:[%s2838_s11 + $0x5c] sm:$0x1] }
  0x3d   : > { %v798_v41 = vrot.slane %v796_v60, 4  ;;  %v1419_v46 = vsel %vm504_vm0, %v2132_v44, 0  ;;  %v406_v51 = vshrl.u32 %v3022_v34, 16  ;;  %v409_v52 = vshll.u32 %v3022_v34, 16 }
  0x3e   : > { %2334 = vmatmul.mubr.msk.bf16.gmra.mrb[4].mxu0 %vm479_vm4, %v3024_v35  ;;  %2265 = vmatprep.mubr.msk.bf16.mxu1 %vm479_vm4, %v3024_v35  ;;  %v389_v47 = vrot.slane %v388_v37, 4  ;;  %v398_v48 = vor.u32 %v397_v38, %v393_v29  ;;  %v797_v44 = vsel %vm2990_vm7, %v2078_v20, %v796_v60  ;;  %v415_v55 = vshll.u32 %v3029_v40, 16 }
  0x3f   : > { %2347 = vmatprep.mubr.msk.bf16.mxu0 %vm479_vm4, %v3026_v36  ;;  %v800_v54 = vsel %vm2990_vm7, %v798_v41, %v799_v61  ;;  %v419_v56 = vshrl.u32 %v3029_v40, 16  ;;  %v408_v3 = vrot.slane %v406_v51, 4  ;;  %v411_v12 = vrot.slane %v409_v52, 5  ;;  %v3088_v41 = vld [vmem:[%s3506_s1 + $0x1c] sm:$0xf] }
  0x40   : > { %v394_v59 = vsel %vm2901_vm3, %v389_v47, %v393_v29  ;;  %v399_v63 = vrot.slane %v398_v48, 4  ;;  %v3058_v1 = vcombine.low %v797_v44, %v800_v54  ;;  %v417_v60 = vrot.slane %v415_v55, 5 }
  0x41   : > { %v421_v11 = vrot.slane %v419_v56, 4  ;;  %v425_v43 = vshll.u32 %v3040_v50, 16  ;;  %v2079_v17 = vrot.slane %v2923_v57, 9  ;;  %v803_v18 = vrot.slane %v2931_v62, 5 }
  0x42   : > { %v404_v61 = vsel %vm2901_vm3, %v399_v63, %v403_v42  ;;  %v806_v19 = vrot.slane %v2936_v8, 5  ;;  %v412_v23 = vor.u32 %v411_v12, %v408_v3  ;;  %v430_v33 = vshrl.u32 %v3062_v16, 16 }
  0x43   : > { %v3072_v22 = vcombine.low %v394_v59, %v404_v61  ;;  %v422_v25 = vor.u32 %v421_v11, %v417_v60  ;;  %v427_v26 = vrot.slane %v425_v43, 5  ;;  %v804_v28 = vsel %vm2990_vm7, %v2079_v17, %v803_v18 }
  0x44   : > { %v805_v29 = vrot.slane %v803_v18, 4  ;;  %v433_v37 = vshll.u32 %v3062_v16, 16  ;;  %v413_v8 = vrot.slane %v412_v23, 4  ;;  %v439_v42 = vshll.u32 %v3070_v21, 16 }
  0x45   : > { %2266 = vmatmul.mubr.msk.bf16.gmra.mrb[8].mxu1 %vm479_vm4, %v3072_v22  ;;  %v423_v38 = vrot.slane %v422_v25, 4  ;;  %v443_v20 = vshrl.u32 %v3070_v21, 16  ;;  %v432_v48 = vrot.slane %v430_v33, 4  ;;  %v449_v52 = vshll.u32 %v3075_v27, 16 }
  0x46   : > { %2348 = vmatmul.mubr.msk.bf16.vlgmr.msra.gmra.mrb[0].mxu0 %vm479_vm4, %v3058_v1  ;;  %v807_v47 = vsel %vm2990_vm7, %v805_v29, %v806_v19  ;;  %v435_v51 = vrot.slane %v433_v37, 5  ;;  %v418_v44 = vsel %vm2901_vm3, %v413_v8, %v417_v60  ;;  %v441_v56 = vrot.slane %v439_v42, 5 }
  0x47   : > { %2364 = vmatpush3.bf16.msra.mxu0 %v1419_v46  ;;  %v428_v54 = vsel %vm2901_vm3, %v423_v38, %v427_v26  ;;  %v3099_v55 = vcombine.low %v804_v28, %v807_v47  ;;  %v445_v3 = vrot.slane %v443_v20, 4  ;;  %v451_v12 = vrot.slane %v449_v52, 5 }
  0x48   : > { %v3101_v59 = vcombine.low %v418_v44, %v428_v54  ;;  %v436_v63 = vor.u32 %v435_v51, %v432_v48  ;;  %2555 = vmatprep.subr.msk.bf16.mxu0 %vm504_vm0, %v3088_v41  ;;  %v2080_v46 = vrot.slane %v2939_v9, 9  ;;  %v810_v60 = vrot.slane %v2950_v24, 5  ;;  %v3136_v51 = vld [vmem:[%s2838_s11 + $0x64] sm:$0xf] }
  0x49   : > { %2351 = vmatprep.mubr.msk.bf16.mxu0 %vm479_vm4, %v3099_v55  ;;  %v813_v11 = vrot.slane %v2956_v32, 5  ;;  %v2081_v43 = vrot.slane %v2975_v53, 9  ;;  %v446_v17 = vor.u32 %v445_v3, %v441_v56  ;;  %v817_v18 = vrot.slane %v2986_v58, 5 }
  0x4a   : > { %2269 = vmatprep.mubr.msk.bf16.mxu1 %vm479_vm4, %v3101_v59  ;;  %v437_v61 = vrot.slane %v436_v63, 4  ;;  %v820_v19 = vrot.slane %v3000_v13, 5  ;;  %v811_v23 = vsel %vm2990_vm7, %v2080_v46, %v810_v60  ;;  %v812_v25 = vrot.slane %v810_v60, 4  ;;  %v3159_v60 = vld [vmem:[%s2838_s11 + $0x60] sm:$0xf] }
  0x4b   : > { %v2060_v26 = vcombine.low %v2860_v5, %v2863_v6  ;;  %v447_v28 = vrot.slane %v446_v17, 4  ;;  %v818_v29 = vsel %vm2990_vm7, %v2081_v43, %v817_v18  ;;  %v819_v33 = vrot.slane %v817_v18, 4 }
  0x4c   : > { %v442_v32 = vsel %vm2901_vm3, %v437_v61, %v441_v56  ;;  %v814_v37 = vsel %vm2990_vm7, %v812_v25, %v813_v11  ;;  %v2082_v13 = vrot.slane %v3022_v34, 9  ;;  %v824_v8 = vrot.slane %v3029_v40, 5  ;;  %v3162_v11 = vld [vmem:[%s2838_s11 + $0x68] sm:$0x1] }
  0x4d   : > { %v827_v38 = vrot.slane %v3040_v50, 5  ;;  %v452_v42 = vsel %vm2901_vm3, %v447_v28, %v451_v12  ;;  %v3130_v20 = vcombine.low %v811_v23, %v814_v37  ;;  %v821_v47 = vsel %vm2990_vm7, %v819_v33, %v820_v19 }
  0x4e   : > { %v2083_v48 = vrot.slane %v3062_v16, 9  ;;  %v3138_v52 = vcombine.low %v442_v32, %v452_v42  ;;  %v3140_v44 = vcombine.low %v818_v29, %v821_v47  ;;  %v826_v54 = vrot.slane %v824_v8, 4  ;;  %v2101_v29 = vld [vmem:[%s3506_s1 + $0xc] sm:$0xf] }
  0x4f   : > { %2352 = vmatmul.mubr.msk.bf16.gmra.mrb[4].mxu0 %vm479_vm4, %v3130_v20  ;;  %v831_v50 = vrot.slane %v3070_v21, 5  ;;  %v834_v56 = vrot.slane %v3075_v27, 5  ;;  %v825_v63 = vsel %vm2990_vm7, %v2082_v13, %v824_v8  ;;  %v1279_v12 = vrot.slane %v3136_v51, 5 }
  0x50   : > { %2270 = vmatmul.mubr.msk.bf16.gmra.mrb[12].mxu1 %vm479_vm4, %v3138_v52  ;;  %2355 = vmatprep.mubr.msk.bf16.mxu0 %vm479_vm4, %v3140_v44  ;;  %v828_v3 = vsel %vm2990_vm7, %v826_v54, %v827_v38  ;;  %v785_v43 = vrot.slane %v2867_v7, 5  ;;  %v3167_v61 = vcombine.low %v2879_v14, %v2882_v15  ;;  %v2076_v19 = vrot.slane %v2860_v5, 9 }
  0x51   : > { %2275 = vmatprep.mubr.msk.bf16.mxu1 %vm479_vm4, %v2060_v26  ;;  %v832_v46 = vsel %vm2990_vm7, %v2083_v48, %v831_v50  ;;  %v833_v27 = vrot.slane %v831_v50, 4  ;;  %v3169_v17 = vcombine.low %v825_v63, %v828_v3  ;;  %v782_v23 = vrot.slane %v2863_v6, 5 }
  0x52   : > { %v2121_v26 = vrot.slane %v3159_v60, 9  ;;  %v1281_v32 = vrot.slane %v1279_v12, 4  ;;  %v1282_v7 = vrot.slane %v3162_v11, 5  ;;  %v3181_v14 = vcombine.low %v2897_v30, %v2906_v39 }
  0x53   : > { %v835_v18 = vsel %vm2990_vm7, %v833_v27, %v834_v56  ;;  %v783_v15 = vsel %vm2990_vm7, %v2076_v19, %v782_v23  ;;  %v784_v28 = vrot.slane %v782_v23, 4  ;;  %v887_v5 = vsel %vm504_vm0, %v2972_v49, 0  ;;  %v256_v23 = vld [vmem:[%s2838_s11 + $0x74] sm:$0x1] }
  0x54   : > { %v3175_v25 = vcombine.low %v832_v46, %v835_v18  ;;  %v1280_v30 = vsel %vm2990_vm7, %v2121_v26, %v1279_v12  ;;  %v1283_v39 = vsel %vm2990_vm7, %v1281_v32, %v1282_v7  ;;  %v3209_v37 = vcombine.low %v2923_v57, %v2931_v62 }
  0x55   : > { %v786_v6 = vsel %vm2990_vm7, %v784_v28, %v785_v43  ;;  %v3205_v33 = vcombine.low %v1280_v30, %v1283_v39  ;;  %v3213_v13 = vcombine.low %v2939_v9, %v2950_v24  ;;  %v3225_v57 = vcombine.low %v2975_v53, %v2986_v58  ;;  %v2153_v24 = vld [vmem:[%s3506_s1 + $0x20] sm:$0xf] }
  0x56   : > { %v2085_v49 = vcombine.low %v783_v15, %v786_v6  ;;  %v1567_v62 = vsel %vm504_vm0, %v3088_v41, 0  ;;  %v3231_v9 = vcombine.low %v3022_v34, %v3029_v40  ;;  %v3247_v53 = vcombine.low %v3062_v16, %v3070_v21  ;;  %v3268_v40 = vld [vmem:[%s2838_s11 + $0x6c] sm:$0xf]  ;;  %v3271_v16 = vld [vmem:[%s2838_s11 + $0x70] sm:$0xf] }
  0x57   : > { %2356 = vmatmul.mubr.msk.bf16.gmra.mrb[8].mxu0 %vm479_vm4, %v3169_v17  ;;  %v3258_v58 = vcombine.low %v3159_v60, %v3136_v51  ;;  %v1013_v34 = vsel %vm504_vm0, %v2101_v29, 0  ;;  %v2133_v21 = vcombine.low %v3268_v40, %v3271_v16  ;;  %v1132_v41 = vshll.u32 %v3159_v60, 16 }
  0x58   : > { %2276 = vmatmul.mubr.msk.bf16.vlgmr.msra.gmra.mrb[0].mxu1 %vm479_vm4, %v3167_v61  ;;  %2359 = vmatprep.mubr.msk.bf16.mxu0 %vm479_vm4, %v3175_v25  ;;  %v1142_v8 = vshrl.u32 %v3136_v51, 16  ;;  %v1699_v38 = vsel %vm504_vm0, %v2153_v24, 0  ;;  %v1538_v50 = vshll.u32 %v3268_v40, 16  ;;  %v1548_v56 = vshrl.u32 %v3271_v16, 16 }
  0x59   : > { %2292 = vmatpush3.bf16.msra.mxu1 %v887_v5  ;;  %2279 = vmatprep.mubr.msk.bf16.mxu1 %vm479_vm4, %v3181_v14  ;;  %v1134_v47 = vrot.slane %v1132_v41, 5  ;;  %v1148_v3 = vshll.u32 %v3162_v11, 16  ;;  %v1554_v11 = vshll.u32 %v256_v23, 16  ;;  %v2152_v31 = vrot.slane %v3268_v40, 9 }
  0x5a   : > { %2550 = vmatprep.subr.msk.bf16.mxu1 %vm504_vm0, %v2101_v29  ;;  %v1144_v54 = vrot.slane %v1142_v8, 4  ;;  %v1540_v46 = vrot.slane %v1538_v50, 5 }
  0x5b   : > { %v1150_v19 = vrot.slane %v1148_v3, 5  ;;  %v1556_v6 = vrot.slane %v1554_v11, 5 }
  0x5f   : > { %2360 = vmatmul.mubr.msk.bf16.gmra.mrb[12].mxu0 %vm479_vm4, %v3205_v33 }
  0x60   : > { %2280 = vmatmul.mubr.msk.bf16.gmra.mrb[4].mxu1 %vm479_vm4, %v3209_v37  ;;  %2365 = vmatprep.mubr.msk.bf16.mxu0 %vm479_vm4, %v3181_v14 }
  0x61   : > { %2283 = vmatprep.mubr.msk.bf16.mxu1 %vm479_vm4, %v3213_v13 }
  0x67   : > { %2366 = vmatmul.mubr.msk.bf16.vlgmr.msra.gmra.mrb[0].mxu0 %vm479_vm4, %v3209_v37 }
  0x68   : > { %2284 = vmatmul.mubr.msk.bf16.gmra.mrb[8].mxu1 %vm479_vm4, %v3225_v57  ;;  %2382 = vmatpush3.bf16.msra.mxu0 %v1567_v62 }
  0x69   : > { %2287 = vmatprep.mubr.msk.bf16.mxu1 %vm479_vm4, %v3231_v9  ;;  %2369 = vmatprep.mubr.msk.bf16.mxu0 %vm479_vm4, %v3213_v13 }
  0x6a   : > { %2556 = vmatprep.subr.msk.bf16.mxu0 %vm504_vm0, %v2153_v24 }
  0x6f   : > { %2370 = vmatmul.mubr.msk.bf16.gmra.mrb[4].mxu0 %vm479_vm4, %v3225_v57 }
  0x70   : > { %2288 = vmatmul.mubr.msk.bf16.gmra.mrb[12].mxu1 %vm479_vm4, %v3247_v53  ;;  %2373 = vmatprep.mubr.msk.bf16.mxu0 %vm479_vm4, %v3231_v9 }
  0x71   : > { %2293 = vmatprep.mubr.msk.bf16.mxu1 %vm479_vm4, %v2085_v49 }
  0x77   : > { %2374 = vmatmul.mubr.msk.bf16.gmra.mrb[8].mxu0 %vm479_vm4, %v3247_v53 }
  0x78   : > { %2294 = vmatmul.mubr.msk.bf16.vlgmr.msra.gmra.mrb[0].mxu1 %vm479_vm4, %v3026_v36  ;;  %2377 = vmatprep.mubr.msk.bf16.mxu0 %vm479_vm4, %v3258_v58  ;;  %v1129_v36 = vshrl.u32 %v3159_v60, 16  ;;  %v1550_v60 = vrot.slane %v1548_v56, 4 }
  0x79   : > { %2310 = vmatpush3.bf16.msra.mxu1 %v1013_v34  ;;  %2297 = vmatprep.mubr.msk.bf16.mxu1 %vm479_vm4, %v3058_v1 }
  0x7a   : > { %2552 = vmatprep.subr.msk.bf16.mxu1 %vm504_vm0, %v2849_v2  ;;  %v1138_v2 = vshll.u32 %v3136_v51, 16  ;;  %v1131_v42 = vrot.slane %v1129_v36, 4  ;;  %v1544_v51 = vshll.u32 %v3271_v16, 16 }
  0x7c   : > { %v1140_v48 = vrot.slane %v1138_v2, 5  ;;  %v1546_v27 = vrot.slane %v1544_v51, 5 }
  0x7e   : > { %v1145_v63 = vor.u32 %v1144_v54, %v1140_v48  ;;  %v1551_v26 = vor.u32 %v1550_v60, %v1546_v27 }
  0x7f   : > { %2378 = vmatmul.mubr.msk.bf16.gmra.mrb[12].mxu0 %vm479_vm4, %v2133_v21 }
  0x80   : > { %2298 = vmatmul.mubr.msk.bf16.gmra.mrb[4].mxu1 %vm479_vm4, %v3099_v55  ;;  %2383 = vmatprep.mubr.msk.bf16.mxu0 %vm479_vm4, %v2966_v45  ;;  %v1535_v45 = vshrl.u32 %v3268_v40, 16  ;;  %v1146_v18 = vrot.slane %v1145_v63, 4  ;;  %v1552_v5 = vrot.slane %v1551_v26, 4 }
  0x81   : > { %2301 = vmatprep.mubr.msk.bf16.mxu1 %vm479_vm4, %v3130_v20 }
  0x82   : > { %v1537_v12 = vrot.slane %v1535_v45, 4  ;;  %v1151_v7 = vsel %vm2901_vm3, %v1146_v18, %v1150_v19  ;;  %v1557_v29 = vsel %vm2901_vm3, %v1552_v5, %v1556_v6 }
  0x87   : > { %2384 = vmatmul.mubr.msk.bf16.vlgmr.msra.gmra.mrb[0].mxu0 %vm479_vm4, %v2996_v10  ;;  %v1135_v10 = vor.u32 %v1134_v47, %v1131_v42 }
  0x88   : > { %2302 = vmatmul.mubr.msk.bf16.gmra.mrb[8].mxu1 %vm479_vm4, %v3140_v44  ;;  %2400 = vmatpush3.bf16.msra.mxu0 %v1699_v38 }
  0x89   : > { %2305 = vmatprep.mubr.msk.bf16.mxu1 %vm479_vm4, %v3169_v17  ;;  %2387 = vmatprep.mubr.msk.bf16.mxu0 %vm479_vm4, %v3024_v35  ;;  %v1136_v43 = vrot.slane %v1135_v10, 4  ;;  %v1541_v35 = vor.u32 %v1540_v46, %v1537_v12 }
  0x8b   : > { %v1141_v32 = vsel %vm2901_vm3, %v1136_v43, %v1140_v48  ;;  %v1542_v28 = vrot.slane %v1541_v35, 4 }
  0x8c   : > { %v2112_v15 = vcombine.low %v1141_v32, %v1151_v7 }
  0x8f   : > { %2388 = vmatmul.mubr.msk.bf16.gmra.mrb[4].mxu0 %vm479_vm4, %v3072_v22 }
  0x90   : > { %2306 = vmatmul.mubr.msk.bf16.gmra.mrb[12].mxu1 %vm479_vm4, %v3175_v25  ;;  %2391 = vmatprep.mubr.msk.bf16.mxu0 %vm479_vm4, %v3101_v59 }
  0x91   : > { %2311 = vmatprep.mubr.msk.bf16.mxu1 %vm479_vm4, %v3167_v61  ;;  %v1547_v61 = vsel %vm2901_vm3, %v1542_v28, %v1546_v27 }
  0x92   : > { %v2143_v30 = vcombine.low %v1547_v61, %v1557_v29 }
  0x97   : > { %2392 = vmatmul.mubr.msk.bf16.gmra.mrb[8].mxu0 %vm479_vm4, %v3138_v52 }
  0x98   : > { %2312 = vmatmul.mubr.msk.bf16.vlgmr.msra.gmra.mrb[0].mxu1 %vm479_vm4, %v3181_v14  ;;  %2395 = vmatprep.mubr.msk.bf16.mxu0 %vm479_vm4, %v2112_v15 }
  0x99   : > { %2418 = vmatpush3.bf16.msra.mxu1 %v2857_v4  ;;  %2315 = vmatprep.mubr.msk.bf16.mxu1 %vm479_vm4, %v3209_v37  ;;  %v1685_v4 = vrot.slane %v3271_v16, 5 }
  0x9f   : > { %2396 = vmatmul.mubr.msk.bf16.gmra.mrb[12].mxu0 %vm479_vm4, %v2143_v30 }
  0xa0   : > { %2316 = vmatmul.mubr.msk.bf16.gmra.mrb[4].mxu1 %vm479_vm4, %v3213_v13  ;;  %2401 = vmatprep.mubr.msk.bf16.mxu0 %vm479_vm4, %v3058_v1  ;;  %v1687_v1 = vrot.slane %v1685_v4, 4 }
  0xa1   : > { %2319 = vmatprep.mubr.msk.bf16.mxu1 %vm479_vm4, %v3225_v57 }
  0xa7   : > { %2402 = vmatmul.mubr.msk.bf16.vlgmr.msra.gmra.mrb[0].mxu0 %vm479_vm4, %v3099_v55  ;;  %v1688_v55 = vrot.slane %v256_v23, 5 }
  0xa8   : > { %2320 = vmatmul.mubr.msk.bf16.gmra.mrb[8].mxu1 %vm479_vm4, %v3231_v9  ;;  %2405 = vmatprep.mubr.msk.bf16.mxu0 %vm479_vm4, %v3130_v20  ;;  %v1686_v20 = vsel %vm2990_vm7, %v2152_v31, %v1685_v4 }
  0xa9   : > { %2323 = vmatprep.mubr.msk.bf16.mxu1 %vm479_vm4, %v3247_v53 }
  0xaf   : > { %2406 = vmatmul.mubr.msk.bf16.gmra.mrb[4].mxu0 %vm479_vm4, %v3140_v44  ;;  %v1689_v44 = vsel %vm2990_vm7, %v1687_v1, %v1688_v55 }
  0xb0   : > { %2324 = vmatmul.mubr.msk.bf16.gmra.mrb[12].mxu1 %vm479_vm4, %v3258_v58  ;;  %2409 = vmatprep.mubr.msk.bf16.mxu0 %vm479_vm4, %v3169_v17 }
  0xb1   : > { %2337 = vmatprep.mubr.msk.bf16.mxu1 %vm479_vm4, %v3072_v22  ;;  %v2154_v22 = vcombine.low %v1686_v20, %v1689_v44 }
  0xb7   : > { %2410 = vmatmul.mubr.msk.bf16.gmra.mrb[8].mxu0 %vm479_vm4, %v3175_v25 }
  0xb8   : > { %2338 = vmatmul.mubr.msk.bf16.vlgmr.msra.gmra.mrb[8].mxu1 %vm479_vm4, %v3101_v59  ;;  %2413 = vmatprep.mubr.msk.bf16.mxu0 %vm479_vm4, %v3205_v33 }
  0xb9   : > { %2341 = vmatprep.mubr.msk.bf16.mxu1 %vm479_vm4, %v3138_v52  ;;  %v3371_v52 = vld [vmem:[%s3507_s2] ss:$0 sm:$0xff] }
  0xbf   : > { %2414 = vmatmul.mubr.msk.bf16.gmra.mrb[12].mxu0 %vm479_vm4, %v2154_v22 }
  0xc0   : > { %2342 = vmatmul.mubr.msk.bf16.gmra.mrb[12].mxu1 %vm479_vm4, %v2112_v15 }
 0x16b   : > { %v2313_v17 = vpop.f32.mrb[0].mxu1 }
 0x16c   : > { %v1049_v25 = vpop.f32.mrb[1].mxu1 }
 0x16d   : > { %v2314_v59 = vpop.f32.mrb[2].mxu1 }
 0x16e   : > { %v1052_v14 = vpop.f32.mrb[3].mxu1 }
 0x173   : > { %v2317_v39 = vpop.f32.mrb[4].mxu1 }
 0x174   : > { %v1065_v49 = vpop.f32.mrb[5].mxu1 }
 0x175   : > { %v2318_v33 = vpop.f32.mrb[6].mxu1 }
 0x176   : > { %v1068_v37 = vpop.f32.mrb[7].mxu1 }
 0x17a   : > { %v2403_v0 = vpop.f32.mrb[0].mxu0 }
 0x17b   : > { %v2419_v13 = vadd.f32 %v2403_v0, %v2313_v17  ;;  %v1735_v57 = vpop.f32.mrb[1].mxu0 }
 0x17c   : > { %v2420_v62 = vadd.f32 %v1735_v57, %v1049_v25  ;;  %v2404_v9 = vpop.f32.mrb[2].mxu0 }
 0x17d   : > { %v1823_v24 = vadd.f32 %v2419_v13, %v3371_v52  ;;  %v2421_v53 = vadd.f32 %v2404_v9, %v2314_v59  ;;  %v1738_v58 = vpop.f32.mrb[3].mxu0 }
 0x17e   : > { %v1821_v34 = vadd.f32 %v2420_v62, %v3371_v52  ;;  %v2422_v40 = vadd.f32 %v1738_v58, %v1052_v14 }
 0x17f   : > { %1839 = vst [vmem:[%s2840_s12 + $0x10] sm:$0xff] %v1823_v24  ;;  %v1824_v16 = vadd.f32 %v2421_v53, %v3371_v52  ;;  %v1880_v47 = vmul.f32 %v1823_v24, %v1823_v24 }
 0x180   : > { %1837 = vst [vmem:[%s2840_s12] sm:$0xff] %v1821_v34  ;;  %v1822_v21 = vadd.f32 %v2422_v40, %v3371_v52  ;;  %v1878_v36 = vmul.f32 %v1821_v34, %v1821_v34 }
 0x181   : > { %1840 = vst [vmem:[%s2840_s12 + $0x18] sm:$0xff] %v1824_v16  ;;  %v1881_v56 = vmul.f32 %v1824_v16, %v1824_v16 }
 0x182   : > { %1838 = vst [vmem:[%s2840_s12 + $0x8] sm:$0xff] %v1822_v21  ;;  %v1854_v41 = vadd.f32 %v1822_v21, %v1821_v34  ;;  %v1879_v2 = vmul.f32 %v1822_v21, %v1822_v21  ;;  %v2407_v8 = vpop.f32.mrb[4].mxu0 }
 0x183   : > { %v2423_v38 = vadd.f32 %v2407_v8, %v2317_v39  ;;  %v1751_v42 = vpop.f32.mrb[5].mxu0 }
 0x184   : > { %v1855_v48 = vadd.f32 %v1854_v41, %v1823_v24  ;;  %v1894_v54 = vadd.f32 %v1879_v2, %v1878_v36  ;;  %v2424_v45 = vadd.f32 %v1751_v42, %v1065_v49  ;;  %v2408_v50 = vpop.f32.mrb[6].mxu0 }
 0x185   : > { %v1827_v51 = vadd.f32 %v2423_v38, %v3371_v52  ;;  %v2425_v10 = vadd.f32 %v2408_v50, %v2318_v33  ;;  %v1754_v63 = vpop.f32.mrb[7].mxu0 }
 0x186   : > { %v1895_v3 = vadd.f32 %v1894_v54, %v1880_v47  ;;  %v1825_v12 = vadd.f32 %v2424_v45, %v3371_v52  ;;  %v1856_v46 = vadd.f32 %v1855_v48, %v1824_v16  ;;  %v2426_v27 = vadd.f32 %v1754_v63, %v1068_v37 }
 0x187   : > { %1843 = vst [vmem:[%s2840_s12 + $0x30] sm:$0xff] %v1827_v51  ;;  %v1828_v60 = vadd.f32 %v2425_v10, %v3371_v52  ;;  %v1884_v28 = vmul.f32 %v1827_v51, %v1827_v51 }
 0x188   : > { %1841 = vst [vmem:[%s2840_s12 + $0x20] sm:$0xff] %v1825_v12  ;;  %v1857_v43 = vadd.f32 %v1856_v46, %v1825_v12  ;;  %v1882_v18 = vmul.f32 %v1825_v12, %v1825_v12  ;;  %v1896_v19 = vadd.f32 %v1895_v3, %v1881_v56  ;;  %v1826_v23 = vadd.f32 %v2426_v27, %v3371_v52 }
 0x189   : > { %1844 = vst [vmem:[%s2840_s12 + $0x38] sm:$0xff] %v1828_v60  ;;  %v1885_v4 = vmul.f32 %v1828_v60, %v1828_v60 }
 0x18a   : > { %v1897_v35 = vadd.f32 %v1896_v19, %v1882_v18  ;;  %1842 = vst [vmem:[%s2840_s12 + $0x28] sm:$0xff] %v1826_v23  ;;  %v1858_v26 = vadd.f32 %v1857_v43, %v1826_v23  ;;  %v1883_v11 = vmul.f32 %v1826_v23, %v1826_v23  ;;  %v2411_v32 = vpop.f32.mrb[8].mxu0 }
 0x18b   : > { %v2339_v7 = vpop.f32.mrb[8].mxu1  ;;  %v1767_v15 = vpop.f32.mrb[9].mxu0 }
 0x18c   : > { %v1859_v5 = vadd.f32 %v1858_v26, %v1827_v51  ;;  %v1898_v6 = vadd.f32 %v1897_v35, %v1883_v11  ;;  %v2427_v61 = vadd.f32 %v2411_v32, %v2339_v7  ;;  %v1229_v29 = vpop.f32.mrb[9].mxu1  ;;  %v2412_v30 = vpop.f32.mrb[10].mxu0 }
 0x18d   : > { %v2428_v31 = vadd.f32 %v1767_v15, %v1229_v29  ;;  %v2340_v1 = vpop.f32.mrb[10].mxu1  ;;  %v1770_v55 = vpop.f32.mrb[11].mxu0 }
 0x18e   : > { %v1899_v20 = vadd.f32 %v1898_v6, %v1884_v28  ;;  %v1831_v44 = vadd.f32 %v2427_v61, %v3371_v52  ;;  %v1860_v22 = vadd.f32 %v1859_v5, %v1828_v60  ;;  %v2429_v17 = vadd.f32 %v2412_v30, %v2340_v1  ;;  %v1232_v25 = vpop.f32.mrb[11].mxu1 }
 0x18f   : > { %v1829_v59 = vadd.f32 %v2428_v31, %v3371_v52  ;;  %v2430_v14 = vadd.f32 %v1770_v55, %v1232_v25 }
 0x190   : > { %1847 = vst [vmem:[%s2840_s12 + $0x50] sm:$0xff] %v1831_v44  ;;  %v1900_v39 = vadd.f32 %v1899_v20, %v1885_v4  ;;  %v1832_v49 = vadd.f32 %v2429_v17, %v3371_v52  ;;  %v1888_v16 = vmul.f32 %v1831_v44, %v1831_v44 }
 0x191   : > { %1845 = vst [vmem:[%s2840_s12 + $0x40] sm:$0xff] %v1829_v59  ;;  %v1861_v33 = vadd.f32 %v1860_v22, %v1829_v59  ;;  %v1886_v37 = vmul.f32 %v1829_v59, %v1829_v59  ;;  %v1830_v0 = vadd.f32 %v2430_v14, %v3371_v52 }
 0x192   : > { %1848 = vst [vmem:[%s2840_s12 + $0x58] sm:$0xff] %v1832_v49  ;;  %v2415_v13 = vpop.f32.mrb[12].mxu0  ;;  %v1889_v38 = vmul.f32 %v1832_v49, %v1832_v49 }
 0x193   : > { %v1901_v57 = vadd.f32 %v1900_v39, %v1886_v37  ;;  %1846 = vst [vmem:[%s2840_s12 + $0x48] sm:$0xff] %v1830_v0  ;;  %v1862_v62 = vadd.f32 %v1861_v33, %v1830_v0  ;;  %v1887_v9 = vmul.f32 %v1830_v0, %v1830_v0  ;;  %v2343_v24 = vpop.f32.mrb[12].mxu1  ;;  %v1783_v53 = vpop.f32.mrb[13].mxu0 }
 0x194   : > { %v2431_v58 = vadd.f32 %v2415_v13, %v2343_v24  ;;  %v1245_v34 = vpop.f32.mrb[13].mxu1  ;;  %v2416_v40 = vpop.f32.mrb[14].mxu0 }
 0x195   : > { %v1863_v21 = vadd.f32 %v1862_v62, %v1831_v44  ;;  %v1902_v36 = vadd.f32 %v1901_v57, %v1887_v9  ;;  %v2432_v41 = vadd.f32 %v1783_v53, %v1245_v34  ;;  %v2344_v2 = vpop.f32.mrb[14].mxu1  ;;  %v1786_v8 = vpop.f32.mrb[15].mxu0 }
 0x196   : > { %v1835_v42 = vadd.f32 %v2431_v58, %v3371_v52  ;;  %v2433_v47 = vadd.f32 %v2416_v40, %v2344_v2  ;;  %v1248_v48 = vpop.f32.mrb[15].mxu1 }
 0x197   : > { %v1903_v54 = vadd.f32 %v1902_v36, %v1888_v16  ;;  %v1833_v45 = vadd.f32 %v2432_v41, %v3371_v52  ;;  %v1864_v50 = vadd.f32 %v1863_v21, %v1832_v49  ;;  %v2434_v56 = vadd.f32 %v1786_v8, %v1248_v48 }
 0x198   : > { %1851 = vst [vmem:[%s2840_s12 + $0x70] sm:$0xff] %v1835_v42  ;;  %v1836_v51 = vadd.f32 %v2433_v47, %v3371_v52 }
 0x199   : > { %1849 = vst [vmem:[%s2840_s12 + $0x60] sm:$0xff] %v1833_v45  ;;  %v1865_v10 = vadd.f32 %v1864_v50, %v1833_v45  ;;  %v1890_v63 = vmul.f32 %v1833_v45, %v1833_v45  ;;  %v1904_v3 = vadd.f32 %v1903_v54, %v1889_v38  ;;  %v1834_v12 = vadd.f32 %v2434_v56, %v3371_v52 }
 0x19a   : > { %1852 = vst [vmem:[%s2840_s12 + $0x78] sm:$0xff] %v1836_v51 }
 0x19b   : > { %v1905_v46 = vadd.f32 %v1904_v3, %v1890_v63  ;;  %1850 = vst [vmem:[%s2840_s12 + $0x68] sm:$0xff] %v1834_v12  ;;  %v1866_v27 = vadd.f32 %v1865_v10, %v1834_v12  ;;  %v1891_v60 = vmul.f32 %v1834_v12, %v1834_v12 }
 0x19c   : > { %2637 = shalt.err (!%p2634_p7)
}
 0x19d   : > { %s2638_s30 = scalar_lea.hbm %s3406_s8, 2048  ;;  %s2642_s17 = scalar_lea.hbm %s3508_s3, 8192 }
 0x19e   : > { %p2639_p8 = scmp.ne.s32.totalorder %s3406_s8, %s2638_s30  ;;  %p2643_p11 = scmp.lt.u32.totalorder %s3406_s8, %s3508_s3 }
 0x19f   : > { %p2644_p12 = scmp.lt.u32.totalorder %s2642_s17, %s2638_s30  ;;  %p2646_p0 = scmp.lt.u32.totalorder %s2638_s30, %s3406_s8 }
 0x1a0   : > { %p2640_p9 = pnand %p2639_p8, %p2820_p5 }
 0x1a1   : > { %p2645_p13 = por %p2644_p12, %p2643_p11 }
 0x1a2   : > { %p2641_p10 = pneg %p2640_p9 }
 0x1a3   : > { %p2647_p1 = por %p2646_p0, %p2645_p13 }
 0x1a5   : > { %p2648_p3 = pnand %p2647_p1, %p2641_p10 }
 0x1a7   : > { %2651 = shalt.err (!%p2648_p3)
}
 0x1a8   : > { %s2746_s25 = smov 128   ;;  %s2747_s6 = smov 8   ;;  %v1892_v52 = vmul.f32 %v1835_v42, %v1835_v42  ;;  %v1867_v43 = vadd.f32 %v1866_v27, %v1835_v42  ;;  %v1906_v18 = vadd.f32 %v1905_v46, %v1891_v60  ;;  %v1893_v19 = vmul.f32 %v1836_v51, %v1836_v51  ;;  %v1853_v30 = vld [vmem:[#allocation4] sm:$0x1]  ;;  %v1877_v1 = vld [vmem:[#allocation6] sm:$0x1] }
 0x1a9   : > { %2558 = dma.vmem_to_hbm [thread:$0]  (%p2820_p5), %s3408_s26, 2048, %s3406_s8, %s3416_s9, %s2746_s25, %s2746_s25, %s2747_s6  }
 0x1aa   : > { %v1907_v23 = vadd.f32 %v1906_v18, %v1892_v52  ;;  %v1868_v35 = vadd.f32 %v1867_v43, %v1836_v51  ;;  %s2748_s28 = smov [#allocation4]   ;;  %s2749_s7 = smov [#allocation6]  }
 0x1ab   : > { %s1945_s26 = sshll.u32 %s2748_s28, 4  ;;  %s1956_s8 = sshll.u32 %s2749_s7, 4  ;;  %s1946_s26 = int_to_ptr.vmem [resolvable:$true] %s1945_s26  ;;  %s3440_s8 = int_to_ptr.vmem [resolvable:$true] %s1956_s8 }
 0x1ac   : > { %v1869_v26 = vrot.slane %v1868_v35, 4  ;;  %v1908_v11 = vadd.f32 %v1907_v23, %v1893_v19  ;;  %s2652_s9 = scalar_lea.vmem %s1946_s26, 16  ;;  %s2658_s10 = scalar_lea.vmem %s1946_s26, 32 }
 0x1ad   : > { %p2653_p5 = scmp.ne.s32.totalorder %s1946_s26, %s2652_s9  ;;  %p2659_p8 = scmp.lt.s32.totalorder %s1946_s26, %s1946_s26 }
 0x1ae   : > { %v1870_v32 = vadd.f32 %v1869_v26, %v1868_v35  ;;  %v1909_v7 = vrot.slane %v1908_v11, 4  ;;  %p2660_p9 = scmp.lt.s32.totalorder %s2658_s10, %s2652_s9 }
 0x1af   : > { %p2654_p4 = pnand %p2653_p5, %p106_p2 }
 0x1b0   : > { %v1871_v15 = vrot.slane %v1870_v32, 2  ;;  %v1910_v28 = vadd.f32 %v1909_v7, %v1908_v11  ;;  %p2661_p10 = por %p2660_p9, %p2659_p8 }
 0x1b1   : > { %p2655_p7 = pneg %p2654_p4 }
 0x1b2   : > { %v1872_v5 = vadd.f32 %v1871_v15, %v1870_v32  ;;  %v1911_v6 = vrot.slane %v1910_v28, 2 }
 0x1b3   : > { %p2662_p11 = pnand %p2661_p10, %p2655_p7 }
 0x1b4   : > { %v1873_v61 = vrot.slane %v1872_v5, 1  ;;  %v1912_v29 = vadd.f32 %v1911_v6, %v1910_v28 }
 0x1b6   : > { %v1874_v4 = vadd.f32 %v1873_v61, %v1872_v5  ;;  %v1913_v31 = vrot.slane %v1912_v29, 1 }
 0x1b8   : > { %v1875_v55 = vadd.f32 %v1874_v4, %v1853_v30  ;;  %v1914_v20 = vadd.f32 %v1913_v31, %v1912_v29 }
 0x1ba   : > { %1876 = vst [vmem:[#allocation4] sm:$0x1] %v1875_v55  ;;  %v1915_v44 = vadd.f32 %v1914_v20, %v1877_v1 }
 0x1bb   : > { %2665 = shalt.err (!%p2662_p11)
}
 0x1bc   : > { %s2666_s15 = scalar_lea.hbm %s3509_s4, 16 }
 0x1bd   : > { %p2667_p12 = scmp.ne.s32.totalorder %s3509_s4, %s2666_s15  ;;  %p2672_p1 = scmp.lt.u32.totalorder %s2666_s15, %s3509_s4 }
 0x1bf   : > { %p2668_p13 = pnand %p2667_p12, %p106_p2 }
 0x1c1   : > { %p2669_p0 = pneg %p2668_p13 }
 0x1c3   : > { %p2674_p3 = pnand %p2672_p1, %p2669_p0 }
 0x1c5   : > { %2677 = shalt.err (!%p2674_p3)
}
 0x1c6   : > { %2560 = dma.vmem_to_hbm [thread:$0]  (%p106_p2), %s1946_s26, 16, %s3509_s4, [#allocation5]   ;;  %1916 = vst [vmem:[#allocation6] sm:$0x1] %v1915_v44 }
 0x1c7   : > { %s2678_s25 = scalar_lea.vmem %s3440_s8, 16  ;;  %s2684_s6 = scalar_lea.vmem %s3440_s8, 32 }
 0x1c8   : > { %p2679_p5 = scmp.ne.s32.totalorder %s3440_s8, %s2678_s25  ;;  %p2685_p8 = scmp.lt.s32.totalorder %s3440_s8, %s3440_s8 }
 0x1c9   : > { %p2686_p9 = scmp.lt.s32.totalorder %s2684_s6, %s2678_s25 }
 0x1ca   : > { %p2680_p4 = pnand %p2679_p5, %p106_p2 }
 0x1cb   : > { %p2687_p10 = por %p2686_p9, %p2685_p8 }
 0x1cc   : > { %p2681_p7 = pneg %p2680_p4 }
 0x1ce   : > { %p2688_p11 = pnand %p2687_p10, %p2681_p7 }
 0x1d0   : > { %2691 = shalt.err (!%p2688_p11)
}
 0x1d1   : > { %s2692_s9 = scalar_lea.hbm %s3510_s5, 16 }
 0x1d2   : > { %p2693_p12 = scmp.ne.s32.totalorder %s3510_s5, %s2692_s9  ;;  %p2698_p1 = scmp.lt.u32.totalorder %s2692_s9, %s3510_s5 }
 0x1d4   : > { %p2694_p13 = pnand %p2693_p12, %p106_p2 }
 0x1d6   : > { %p2695_p0 = pneg %p2694_p13 }
 0x1d8   : > { %p2700_p3 = pnand %p2698_p1, %p2695_p0 }
 0x1da   : > { %2703 = shalt.err (!%p2700_p3)
}
 0x1db   : > { %2562 = dma.vmem_to_hbm [thread:$0]  (%p106_p2), %s3440_s8, 16, %s3510_s5, [#allocation5]  }
 0x1dc   : > { %2721 = dma.done.wait (%p106_p2), [#allocation5], 32  }
 0x1dd   : > { %2723 = vsyncadd (%p106_p2), [#allocation5], 4294967264 }
 0x1de PF: > { %p2576_p5 = scmp.ge.s32.totalorder %s2742_s21, 2  ;;  %s1976_s12 = sand.u32 1, %s2730_s18  }
 0x1df   : > { %s1977_s16 = scalar_lea.sflag [#allocation3], %s1976_s12 }
 0x1e0   : > { %p2569_p4 = pnand %p2576_p5, %p2824_p6 }
 0x1e2   : > { %2725 = dma.done.wait (!%p2569_p4), %s1977_s16, 2048  }
 0x1e3   : > { %2727 = vsyncadd (!%p2569_p4), %s1977_s16, 4294965248  ;;  %p17_p7 = scmp.ge.s32.totalorder %s2805_s24, 6   ;;  %s3517_s18 = smov %s2734_s19 }
 0x1e4   : > { %s3518_s19 = smov %s2738_s20  ;;  %s3519_s20 = smov %s2816_s27 }
 0x1e5   : > { %s3520_s21 = smov %s2805_s24  ;;  %19 = sbr.rel (!%p17_p7) target bundleno = 4 (0x4), region = 95 }
 0x1ec   :  { %1982 = vsyncpa [#allocation3], 1 }
 0x1ed   :  { %1984 = vsyncpa [#allocation3 + $0x1], 1 }
 0x1ee   :  { %1985 = vsyncpa [#allocation5], 1 }

</bundles_post_ra>
